<compile_context>
chip_gen: v6e
topology: v6e:2x2x1
jax: 0.10.0
libtpu: 0.0.40
codegen_flags: <defaults>
</compile_context>

<pallas_src>
import jax
import jax.numpy as jnp
from jax.experimental import pallas as pl
from jax.experimental.pallas import tpu as pltpu


def _round_up(x, m):
    return (x + m - 1) // m * m


def _mlp_kernel(x_ref, w_ref, b_ref, o_ref):
    obs_pad = x_ref.shape[1]        # padded observation size (K of layer 1)
    npad = w_ref.shape[1]           # lane-padded hidden width (128-multiple)
    act = o_ref.shape[1]            # action_size
    cdt = w_ref.dtype               # MXU compute dtype (bf16 by default)

    x = x_ref[...]                                      # [TB, obs_pad]
    w1 = w_ref[pl.ds(0, obs_pad), :]                    # [obs_pad, npad]
    w2 = w_ref[pl.ds(obs_pad, npad), :]                 # [npad, npad]
    w3 = w_ref[pl.ds(obs_pad + npad, npad), :]          # [npad, npad]
    b = b_ref[...]                                      # [8, npad] f32

    # Layer 1: Linear + ReLU  (f32 accumulate / f32 elementwise)
    h = jnp.dot(x, w1, preferred_element_type=jnp.float32) + b[0:1, :]
    h = jnp.maximum(h, 0.0).astype(cdt)
    # Layer 2: Linear + ReLU
    h = jnp.dot(h, w2, preferred_element_type=jnp.float32) + b[1:2, :]
    h = jnp.maximum(h, 0.0).astype(cdt)
    # Layer 3: Linear + Tanh (only the first `act` lanes are real outputs)
    h = jnp.dot(h, w3, preferred_element_type=jnp.float32)
    o_ref[...] = jnp.tanh(h[:, :act] + b[2:3, :act]).astype(o_ref.dtype)


def init_params(key, observation_size, fc_units, action_size):
    """Deterministic init mirroring nn.Linear's U(-1/sqrt(fan_in), 1/sqrt(fan_in)).

    Weights are stored [in_features, out_features] (transpose of PyTorch's
    nn.Linear) so each layer is a plain `x @ W + b`.
    """
    dims = [observation_size, fc_units[0], fc_units[1], action_size]
    params = {}
    for i in range(3):
        key, kw, kb = jax.random.split(key, 3)
        fan_in, fan_out = dims[i], dims[i + 1]
        bound = 1.0 / jnp.sqrt(fan_in)
        params[f"w{i+1}"] = jax.random.uniform(
            kw, (fan_in, fan_out), jnp.float32, minval=-bound, maxval=bound)
        params[f"b{i+1}"] = jax.random.uniform(
            kb, (1, fan_out), jnp.float32, minval=-bound, maxval=bound)
    return params


def pack_params(params, observation_size, fc_units, action_size,
                compute_dtype=jnp.bfloat16):
    """Pack the 6 parameter arrays into 2 contiguous, lane-dense slabs."""
    h1, h2 = fc_units
    obs_pad = _round_up(max(observation_size, 8), 8)
    npad = _round_up(max(h1, h2, action_size, 128), 128)

    w_slab = jnp.zeros((obs_pad + 2 * npad, npad), compute_dtype)
    w_slab = w_slab.at[:observation_size, :h1].set(
        params["w1"].astype(compute_dtype))
    w_slab = w_slab.at[obs_pad:obs_pad + h1, :h2].set(
        params["w2"].astype(compute_dtype))
    w_slab = w_slab.at[obs_pad + npad:obs_pad + npad + h2, :action_size].set(
        params["w3"].astype(compute_dtype))

    b_slab = jnp.zeros((8, npad), jnp.float32)
    b_slab = b_slab.at[0, :h1].set(params["b1"].reshape(-1))
    b_slab = b_slab.at[1, :h2].set(params["b2"].reshape(-1))
    b_slab = b_slab.at[2, :action_size].set(params["b3"].reshape(-1))

    return {"w_slab": w_slab, "b_slab": b_slab, "obs_pad": obs_pad,
            "npad": npad, "action_size": action_size}


def continuous_policy_forward(state, packed, *, block_b=512):
    """state: [B, observation_size] f32; packed: output of pack_params."""
    w_slab, b_slab = packed["w_slab"], packed["b_slab"]
    obs_pad, action_size = packed["obs_pad"], packed["action_size"]
    cdt = w_slab.dtype

    B, obs = state.shape
    b_min = _round_up(B, 8)
    tb = _round_up(min(block_b, b_min), 8)          # batch tile (>=8 rows)
    b_rows = _round_up(b_min, tb)                   # padded batch
    grid = (b_rows // tb,)

    x = state.astype(cdt)
    x = jnp.pad(x, ((0, b_rows - B), (0, obs_pad - obs)))

    out = pl.pallas_call(
        _mlp_kernel,
        out_shape=jax.ShapeDtypeStruct((b_rows, action_size), jnp.float32),
        grid=grid,
        in_specs=[
            # batch tile: streamed + double-buffered across grid steps
            pl.BlockSpec((tb, obs_pad), lambda i: (i, 0)),
            # packed weights / biases: constant index -> DMA'd once, resident
            pl.BlockSpec(w_slab.shape, lambda i: (0, 0)),
            pl.BlockSpec(b_slab.shape, lambda i: (0, 0)),
        ],
        out_specs=pl.BlockSpec((tb, action_size), lambda i: (i, 0)),
        compiler_params=pltpu.CompilerParams(
            dimension_semantics=("parallel",)),
    )(x, w_slab, b_slab)
    return out[:B]


def reference_forward_f32(state, params):
    h = jnp.maximum(state @ params["w1"] + params["b1"], 0.0)
    h = jnp.maximum(h @ params["w2"] + params["b2"], 0.0)
    return jnp.tanh(h @ params["w3"] + params["b3"])


def reference_forward_mirrored(state, params, compute_dtype=jnp.bfloat16):
    """Same dtype flow as the kernel: bf16 MXU operands, f32 accumulate/elementwise."""
    cd = compute_dtype
    h = jnp.dot(state.astype(cd), params["w1"].astype(cd),
                preferred_element_type=jnp.float32) + params["b1"]
    h = jnp.maximum(h, 0.0).astype(cd)
    h = jnp.dot(h, params["w2"].astype(cd),
                preferred_element_type=jnp.float32) + params["b2"]
    h = jnp.maximum(h, 0.0).astype(cd)
    h = jnp.dot(h, params["w3"].astype(cd),
                preferred_element_type=jnp.float32) + params["b3"]
    return jnp.tanh(h)


if __name__ == "__main__":
    # config = {'observation_size': 16, 'fc_units': [32, 32], 'action_size': 4,
    #           'activation_funcs': ['ReLU', 'ReLU', 'Tanh']}
    observation_size = 16
    fc_units = (32, 32)
    action_size = 4

    key = jax.random.PRNGKey(0)
    key, k_state = jax.random.split(key)
    params = init_params(key, observation_size, fc_units, action_size)
    packed = pack_params(params, observation_size, fc_units, action_size)

    # Small batch (single grid step).
    batch = 8
    state = jax.random.normal(k_state, (batch, observation_size), jnp.float32)
    out = jax.block_until_ready(continuous_policy_forward(state, packed))
    assert out.shape == (batch, action_size)
    ref_mirror = reference_forward_mirrored(state, params)
    ref_f32 = reference_forward_f32(state, params)
    assert jnp.allclose(out, ref_mirror, atol=1e-4, rtol=1e-4), \
        float(jnp.max(jnp.abs(out - ref_mirror)))
    assert jnp.allclose(out, ref_f32, atol=5e-2, rtol=5e-2), \
        float(jnp.max(jnp.abs(out - ref_f32)))

    # Larger, non-multiple-of-tile batch: exercises the batch grid, remainder
    # padding, and multi-step weight residency.
    key, k2 = jax.random.split(key)
    state2 = jax.random.normal(k2, (300, observation_size), jnp.float32)
    out2 = jax.block_until_ready(
        continuous_policy_forward(state2, packed, block_b=128))
    assert out2.shape == (300, action_size)
    ref2 = reference_forward_mirrored(state2, params)
    assert jnp.allclose(out2, ref2, atol=1e-4, rtol=1e-4), \
        float(jnp.max(jnp.abs(out2 - ref2)))

    print("KERNEL_OK")
</pallas_src>

<mosaic_0001>
module attributes {stable_mosaic.version = 11 : i64} {
  func.func @_mlp_kernel(%arg0: i32, %arg1: memref<8x16xbf16, #tpu.memory_space<vmem>>, %arg2: memref<272x128xbf16, #tpu.memory_space<vmem>>, %arg3: memref<8x128xf32, #tpu.memory_space<vmem>>, %arg4: memref<8x4xf32, #tpu.memory_space<vmem>>) attributes {dimension_semantics = [#tpu.dimension_semantics<parallel>], iteration_bounds = array<i64: 1>, scalar_prefetch = 0 : i64, scratch_operands = 0 : i64, tpu.core_type = #tpu.core_type<tc>, window_params = [{transform_indices = @transform_0, window_bounds = array<i64: 8, 16>}, {pipeline_mode = #tpu.pipeline_mode<synchronous>, transform_indices = @transform_1, window_bounds = array<i64: 272, 128>}, {pipeline_mode = #tpu.pipeline_mode<synchronous>, transform_indices = @transform_2, window_bounds = array<i64: 8, 128>}, {transform_indices = @transform_3, window_bounds = array<i64: 8, 4>}]} {
    %c0 = arith.constant 0 : index
    %c0_0 = arith.constant 0 : index
    %0 = vector.load %arg1[%c0, %c0_0] : memref<8x16xbf16, #tpu.memory_space<vmem>>, vector<8x16xbf16>
    %c0_1 = arith.constant 0 : index
    %c0_2 = arith.constant 0 : index
    %1 = vector.load %arg2[%c0_1, %c0_2] : memref<272x128xbf16, #tpu.memory_space<vmem>>, vector<16x128xbf16>
    %c16 = arith.constant 16 : index
    %c0_3 = arith.constant 0 : index
    %2 = vector.load %arg2[%c16, %c0_3] : memref<272x128xbf16, #tpu.memory_space<vmem>>, vector<128x128xbf16>
    %c144 = arith.constant 144 : index
    %c0_4 = arith.constant 0 : index
    %3 = vector.load %arg2[%c144, %c0_4] : memref<272x128xbf16, #tpu.memory_space<vmem>>, vector<128x128xbf16>
    %c0_5 = arith.constant 0 : index
    %c0_6 = arith.constant 0 : index
    %4 = vector.load %arg3[%c0_5, %c0_6] : memref<8x128xf32, #tpu.memory_space<vmem>>, vector<8x128xf32>
    %cst = arith.constant dense<0.000000e+00> : vector<8x128xf32>
    %5 = tpu.matmul %0, %1, %cst {dimension_numbers = #tpu.dot_dimension_numbers<[1], [0], [0], [1], [0, 0, 1, 1], [], []>} : vector<8x16xbf16>, vector<16x128xbf16>, vector<8x128xf32> -> vector<8x128xf32>
    %6 = vector.extract_strided_slice %4 {offsets = [0, 0], sizes = [1, 128], strides = [1, 1]} : vector<8x128xf32> to vector<1x128xf32>
    %7 = vector.broadcast %6 : vector<1x128xf32> to vector<8x128xf32>
    %8 = arith.addf %5, %7 : vector<8x128xf32>
    %cst_7 = arith.constant 0.000000e+00 : f32
    %9 = vector.broadcast %cst_7 : f32 to vector<8x128xf32>
    %10 = arith.maximumf %8, %9 : vector<8x128xf32>
    %11 = arith.truncf %10 : vector<8x128xf32> to vector<8x128xbf16>
    %cst_8 = arith.constant dense<0.000000e+00> : vector<8x128xf32>
    %12 = tpu.matmul %11, %2, %cst_8 {dimension_numbers = #tpu.dot_dimension_numbers<[1], [0], [0], [1], [0, 0, 1, 1], [], []>} : vector<8x128xbf16>, vector<128x128xbf16>, vector<8x128xf32> -> vector<8x128xf32>
    %13 = vector.extract_strided_slice %4 {offsets = [1, 0], sizes = [1, 128], strides = [1, 1]} : vector<8x128xf32> to vector<1x128xf32>
    %14 = vector.broadcast %13 : vector<1x128xf32> to vector<8x128xf32>
    %15 = arith.addf %12, %14 : vector<8x128xf32>
    %cst_9 = arith.constant 0.000000e+00 : f32
    %16 = vector.broadcast %cst_9 : f32 to vector<8x128xf32>
    %17 = arith.maximumf %15, %16 : vector<8x128xf32>
    %18 = arith.truncf %17 : vector<8x128xf32> to vector<8x128xbf16>
    %cst_10 = arith.constant dense<0.000000e+00> : vector<8x128xf32>
    %19 = tpu.matmul %18, %3, %cst_10 {dimension_numbers = #tpu.dot_dimension_numbers<[1], [0], [0], [1], [0, 0, 1, 1], [], []>} : vector<8x128xbf16>, vector<128x128xbf16>, vector<8x128xf32> -> vector<8x128xf32>
    %20 = vector.extract_strided_slice %19 {offsets = [0, 0], sizes = [8, 4], strides = [1, 1]} : vector<8x128xf32> to vector<8x4xf32>
    %21 = vector.extract_strided_slice %4 {offsets = [2, 0], sizes = [1, 4], strides = [1, 1]} : vector<8x128xf32> to vector<1x4xf32>
    %22 = vector.broadcast %21 : vector<1x4xf32> to vector<8x4xf32>
    %23 = arith.addf %20, %22 : vector<8x4xf32>
    %24 = math.tanh %23 : vector<8x4xf32>
    %c0_11 = arith.constant 0 : index
    %c0_12 = arith.constant 0 : index
    %25 = vector.load %arg4[%c0_11, %c0_12] : memref<8x4xf32, #tpu.memory_space<vmem>>, vector<8x4xf32>
    tpu.vector_store %arg4[%c0_11, %c0_12], %24 {strides = array<i32>} : memref<8x4xf32, #tpu.memory_space<vmem>>, vector<8x4xf32>,
    return
  }
  func.func @transform_0(%arg0: i32) -> (i32, i32) {
    %c0_i32 = arith.constant 0 : i32
    %c0_i32_0 = arith.constant 0 : i32
    return %arg0, %c0_i32 : i32, i32
  }
  func.func @transform_1(%arg0: i32) -> (i32, i32) {
    %c0_i32 = arith.constant 0 : i32
    %c0_i32_0 = arith.constant 0 : i32
    %c0_i32_1 = arith.constant 0 : i32
    return %c0_i32, %c0_i32_0 : i32, i32
  }
  func.func @transform_2(%arg0: i32) -> (i32, i32) {
    %c0_i32 = arith.constant 0 : i32
    %c0_i32_0 = arith.constant 0 : i32
    %c0_i32_1 = arith.constant 0 : i32
    return %c0_i32, %c0_i32_0 : i32, i32
  }
  func.func @transform_3(%arg0: i32) -> (i32, i32) {
    %c0_i32 = arith.constant 0 : i32
    %c0_i32_0 = arith.constant 0 : i32
    return %arg0, %c0_i32 : i32, i32
  }
}

</mosaic_0001>

<bundles_post_ra>
// kernel: tpu_custom_call.1
= control target key start
LH: loop header
LB: loop body
LE: loop exit
PB: predicated region body
PF: predicated region fallthrough
CT: control target
= control target key end

     0   :  { %8 = vsyncpa [#allocation3], 0  ;;  %s573_s0 = inlined_call_operand.hbm [shape: bf16[8,16], index: 0, kind: input, shape index: {}]   ;;  %s574_s1 = inlined_call_operand.hbm [shape: bf16[272,128], index: 1, kind: input, shape index: {}]   ;;  %s575_s2 = inlined_call_operand.hbm [shape: f32[8,128], index: 2, kind: input, shape index: {}]   ;;  %s576_s3 = inlined_call_operand.vmem [shape: f32[8,4], index: 3, kind: output, shape index: {}]  }
   0x1   :  { %9 = vsyncpa [#allocation5], 0  ;;  %s514_s12 = smov [#allocation4]  }
   0x2   :  { %s25_s13 = sshll.u32 %s514_s12, 4  ;;  %s26_s13 = int_to_ptr.vmem [resolvable:$true] %s25_s13 }
   0x3   :  { %s458_s14 = scalar_lea.vmem %s26_s13, 2176  ;;  %p463_p1 = scmp.lt.s32.totalorder %s26_s13, %s26_s13 }
   0x4   :  { %p459_p0 = scmp.ne.s32.totalorder %s26_s13, %s458_s14  ;;  %p464_p2 = scmp.lt.s32.totalorder %s458_s14, %s458_s14 }
   0x6   :  { %p465_p3 = por %p464_p2, %p463_p1 }
   0x8   :  { %p466_p4 = pnand %p465_p3, %p459_p0 }
   0xa   :  { %469 = shalt.err (!%p466_p4)
}
   0xb   :  { %s515_s15 = smov 64   ;;  %s516_s16 = smov 4  }
   0xc   :  { %31 = dma.hbm_to_vmem [thread:$0]  %s574_s1, 2176, %s26_s13, [#allocation5], %s515_s15, %s515_s15, %s516_s16  }
   0xd   :  { %s517_s19 = smov [#allocation2]   ;;  %s518_s21 = smov [#allocation6]  }
   0xe   :  { %s16_s20 = sshll.u32 %s517_s19, 4  ;;  %s38_s22 = sshll.u32 %s518_s21, 4  ;;  %s17_s20 = int_to_ptr.vmem [resolvable:$true] %s16_s20  ;;  %s39_s22 = int_to_ptr.vmem [resolvable:$true] %s38_s22 }
   0xf   :  { %s478_s23 = scalar_lea.vmem %s17_s20, 64  ;;  %p483_p6 = scmp.lt.s32.totalorder %s17_s20, %s17_s20 }
  0x10   :  { %p479_p5 = scmp.ne.s32.totalorder %s17_s20, %s478_s23  ;;  %p484_p7 = scmp.lt.s32.totalorder %s478_s23, %s478_s23 }
  0x12   :  { %p485_p8 = por %p484_p7, %p483_p6 }
  0x14   :  { %p486_p9 = pnand %p485_p8, %p479_p5 }
  0x16   :  { %489 = shalt.err (!%p486_p9)
}
  0x17   :  { %19 = dma.hbm_to_vmem [thread:$0]  %s573_s0, 64, %s17_s20, [#allocation3]  }
  0x18   :  { %s498_s26 = scalar_lea.vmem %s39_s22, 128  ;;  %p503_p11 = scmp.lt.s32.totalorder %s39_s22, %s39_s22 }
  0x19   :  { %p499_p10 = scmp.ne.s32.totalorder %s39_s22, %s498_s26  ;;  %p504_p12 = scmp.lt.s32.totalorder %s498_s26, %s498_s26 }
  0x1b   :  { %p505_p13 = por %p504_p12, %p503_p11 }
  0x1d   :  { %p506_p0 = pnand %p505_p13, %p499_p10 }
  0x1f   :  { %509 = shalt.err (!%p506_p0)
}
  0x20   :  { %41 = dma.hbm_to_vmem [thread:$0]  %s575_s2, 128, %s39_s22, [#allocation5]  }
  0x21   :  { %510 = dma.done.wait [#allocation3], 64  }
  0x22   :  { %511 = vsyncadd [#allocation3], 4294967232 }
  0x23   :  { %512 = dma.done.wait [#allocation5], 2304  }
  0x24   :  { %513 = vsyncadd [#allocation5], 4294964992  ;;  %v519_v0 = vmov 0.0   ;;  %vm520_vm0 = vmmov 0   ;;  %v431_v1 = vld [vmem:[#allocation4] sm:$0xff]   ;;  %vm98_vm1 = vcmask 130048   ;;  %v88_v17 = vlaneseq }
  0x25   :  { %378 = vmatprep.subr.bf16.mxu0 %v519_v0  ;;  %380 = vmatprep.mubr.msk.bf16.mxu0 %vm520_vm0, %v519_v0  ;;  %v52_v2 = vld [vmem:[#allocation2] sm:$0xf]  ;;  %v432_v3 = vld [vmem:[#allocation4 + $0x40] sm:$0xff]   ;;  %v434_v5 = vld [vmem:[#allocation4 + $0x30] sm:$0xff]   ;;  %vm332_vm2 = vcmask 31744  }
  0x26   :  { %384 = vmatprep.subr.bf16.mxu1 %v519_v0  ;;  %400 = vmatprep.mubr.msk.bf16.mxu1 %vm520_vm0, %v519_v0  ;;  %v433_v4 = vld [vmem:[#allocation4 + $0x38] sm:$0xff]   ;;  %v435_v6 = vld [vmem:[#allocation4 + $0x28] sm:$0xff]   ;;  %v436_v7 = vld [vmem:[#allocation4 + $0x20] sm:$0xff]   ;;  %v89_v18 = vshrl.u32 %v88_v17, 7 }
  0x27   :  { %379 = vmatpush3.bf16.msra.mxu0 %v431_v1  ;;  %385 = vmatpush3.bf16.msra.mxu1 %v432_v3  ;;  %v437_v8 = vld [vmem:[#allocation4 + $0x18] sm:$0xff]   ;;  %v438_v9 = vld [vmem:[#allocation4 + $0x10] sm:$0xff]   ;;  %v439_v10 = vld [vmem:[#allocation4 + $0x8] sm:$0xff]  }
  0x28   :  { %404 = vmatprep.subr.bf16.mxu0 %v519_v0  ;;  %386 = vmatprep.subr.bf16.mxu1 %v519_v0  ;;  %v440_v11 = vld [vmem:[#allocation4 + $0x80] sm:$0xff]   ;;  %v441_v12 = vld [vmem:[#allocation4 + $0x78] sm:$0xff]   ;;  %v442_v13 = vld [vmem:[#allocation4 + $0x70] sm:$0xff]   ;;  %v90_v19 = vsub.s32 0, %v89_v18  ;;  %v146_v31 = vsub.s32 1, %v89_v18  ;;  %v328_v40 = vsub.s32 2, %v89_v18 }
  0x29   :  { %v443_v14 = vld [vmem:[#allocation4 + $0x68] sm:$0xff]   ;;  %v444_v15 = vld [vmem:[#allocation4 + $0x60] sm:$0xff]   ;;  %v445_v16 = vld [vmem:[#allocation4 + $0x58] sm:$0xff]  }
  0x2a   :  { %381 = vmatmul.mubr.msk.bf16.vlgmr.msra.gmra.mxu0 %vm98_vm1, %v52_v2  ;;  %v87_v20 = vld [vmem:[#allocation6] sm:$0xff]  ;;  %v446_v29 = vld [vmem:[#allocation4 + $0x50] sm:$0xff]  }
  0x2b   :  { %420 = vmatprep.mubr.msk.bf16.mxu0 %vm520_vm0, %v519_v0  ;;  %387 = vmatpush3.bf16.msra.mxu1 %v433_v4  ;;  %v91_v21 = vrot.slane %v87_v20, %v90_v19  ;;  %v447_v30 = vld [vmem:[#allocation4 + $0x48] sm:$0xff]   ;;  %v147_v32 = vrot.slane %v87_v20, %v146_v31  ;;  %v329_v41 = vrot.slane %v87_v20, %v328_v40 }
  0x2c   :  { %388 = vmatprep.subr.bf16.mxu1 %v519_v0  ;;  %405 = vmatpush3.bf16.msra.mxu0 %v440_v11 }
  0x2d   :  { %406 = vmatprep.subr.bf16.mxu0 %v519_v0 }
  0x2f   :  { %389 = vmatpush3.bf16.msra.mxu1 %v434_v5 }
  0x30   :  { %390 = vmatprep.subr.bf16.mxu1 %v519_v0  ;;  %407 = vmatpush3.bf16.msra.mxu0 %v441_v12 }
  0x31   :  { %408 = vmatprep.subr.bf16.mxu0 %v519_v0 }
  0x33   :  { %391 = vmatpush3.bf16.msra.mxu1 %v435_v6 }
  0x34   :  { %392 = vmatprep.subr.bf16.mxu1 %v519_v0  ;;  %409 = vmatpush3.bf16.msra.mxu0 %v442_v13 }
  0x35   :  { %410 = vmatprep.subr.bf16.mxu0 %v519_v0 }
  0x37   :  { %393 = vmatpush3.bf16.msra.mxu1 %v436_v7 }
  0x38   :  { %394 = vmatprep.subr.bf16.mxu1 %v519_v0  ;;  %411 = vmatpush3.bf16.msra.mxu0 %v443_v14 }
  0x39   :  { %412 = vmatprep.subr.bf16.mxu0 %v519_v0 }
  0x3b   :  { %395 = vmatpush3.bf16.msra.mxu1 %v437_v8 }
  0x3c   :  { %396 = vmatprep.subr.bf16.mxu1 %v519_v0  ;;  %413 = vmatpush3.bf16.msra.mxu0 %v444_v15 }
  0x3d   :  { %414 = vmatprep.subr.bf16.mxu0 %v519_v0 }
  0x3f   :  { %397 = vmatpush3.bf16.msra.mxu1 %v438_v9 }
  0x40   :  { %398 = vmatprep.subr.bf16.mxu1 %v519_v0  ;;  %415 = vmatpush3.bf16.msra.mxu0 %v445_v16 }
  0x41   :  { %416 = vmatprep.subr.bf16.mxu0 %v519_v0 }
  0x43   :  { %399 = vmatpush3.bf16.msra.mxu1 %v439_v10 }
  0x44   :  { %417 = vmatpush3.bf16.msra.mxu0 %v446_v29 }
  0x45   :  { %418 = vmatprep.subr.bf16.mxu0 %v519_v0 }
  0x48   :  { %419 = vmatpush3.bf16.msra.mxu0 %v447_v30 }
  0xea   :  { %v136_v22 = vpop.f32.mrf.mxu0 }
  0xeb   :  { %v137_v23 = vadd.f32 %v136_v22, %v91_v21 }
  0xec   :  { %v382_v24 = vpop.f32.mrf.mxu0 }
  0xed   :  { %v142_v25 = vmax.f32 %v137_v23, 0.0 }
  0xee   :  { %v139_v26 = vpop.f32.mrf.mxu0 }
  0xef   :  { %v143_v27 = vpack.c.bf16 %v142_v25, %v142_v25 }
  0xf0   :  { %v383_v28 = vpop.f32.mrf.mxu0 }
  0xf1   :  { %401 = vmatmul.mubr.bf16.vlgmr.msra.gmra.mxu1 %v143_v27 }
 0x1b1   :  { %v230_v33 = vpop.f32.mrf.mxu1 }
 0x1b2   :  { %v231_v34 = vadd.f32 %v230_v33, %v147_v32 }
 0x1b3   :  { %v402_v35 = vpop.f32.mrf.mxu1 }
 0x1b4   :  { %v236_v36 = vmax.f32 %v231_v34, 0.0 }
 0x1b5   :  { %v233_v37 = vpop.f32.mrf.mxu1 }
 0x1b6   :  { %v237_v38 = vpack.c.bf16 %v236_v36, %v236_v36 }
 0x1b7   :  { %v403_v39 = vpop.f32.mrf.mxu1 }
 0x1b8   :  { %421 = vmatmul.mubr.bf16.vlgmr.msra.gmra.mxu0 %v237_v38 }
 0x278   :  { %v320_v42 = vpop.f32.mrf.mxu0 }
 0x279   :  { %v330_v43 = vadd.f32 %v329_v41, %v320_v42 }
 0x27a   :  { %v422_v44 = vpop.f32.mrf.mxu0 }
 0x27b   :  { %448 = vtanh.f32 %v330_v43 }
 0x27c   :  { %v323_v45 = vpop.f32.mrf.mxu0 }
 0x27e   :  { %v423_v46 = vpop.f32.mrf.mxu0 }
 0x288   :  { %v449_v47 = vpop.eup %448 }
 0x289   :  { %333 = vst.msk [vmem:[%s576_s3] sm:$0xff] %vm332_vm2, %v449_v47 }
 0x28a   :  { %338 = vsyncpa [#allocation3], 1 }
 0x28b   :  { %339 = vsyncpa [#allocation5], 1 }

</bundles_post_ra>
